<compile_context>
chip_gen: v7x
topology: tpu7x:2x2x1
jax: 0.10.0
libtpu: 0.0.40
codegen_flags: <defaults>
</compile_context>

<pallas_src>
import math

import jax
import jax.numpy as jnp
from jax.experimental import pallas as pl
from jax.experimental.pallas import tpu as pltpu


IN_FEATURES = 3
HIDDEN = 128
_HALF_LOG_2PI = 0.5 * math.log(2.0 * math.pi)


def _policy_kernel(x_ref, eps_ref, w1_ref, b1_ref, wh_ref, bh_ref, out_ref):
    # Lane-dense layout: the batch sits on the 128-wide lane axis.
    #   x_ref  : (3, TB)    transposed input tile
    #   eps_ref: (1, TB)    transposed N(0,1) noise tile
    #   w1_ref : (128, 3)   fc1 weight, (hidden, in)
    #   b1_ref : (128, 1)   fc1 bias
    #   wh_ref : (2, 128)   fused [mu; std] head weight
    #   bh_ref : (2, 1)     fused [mu; std] head bias
    #   out_ref: (2, TB)    row 0: 2*tanh(action), row 1: corrected log-prob
    x = x_ref[...]
    w1 = w1_ref[...]

    # fc1 + ReLU: K=3 contraction as three VPU broadcast-FMAs (outer products).
    h = (w1[:, 0:1] * x[0:1, :]
         + w1[:, 1:2] * x[1:2, :]
         + w1[:, 2:3] * x[2:3, :]
         + b1_ref[...])                                       # (128, TB)
    h = jnp.maximum(h, 0.0)

    # Fused mu/std heads: one (2,128)@(128,TB) MXU matmul, f32 accumulate.
    heads = jnp.dot(wh_ref[...], h,
                    preferred_element_type=jnp.float32) + bh_ref[...]  # (2, TB)
    mu = heads[0:1, :]
    z = heads[1:2, :]
    std = jnp.logaddexp(z, 0.0)   # numerically-stable softplus (matches F.softplus)

    eps = eps_ref[...]                                        # (1, TB)
    action = mu + std * eps                                   # reparameterized sample
    t = jnp.tanh(action)

    # Normal log-prob with (action-mu)^2/(2*var) == 0.5*eps^2 (exact algebra),
    # and the tanh correction folded into a single log.
    # NOTE: std can underflow to 0 for very negative z -> log(0) = -inf, which
    # mirrors the reference's degenerate behavior at std == 0.
    rlogp = (-0.5 * eps * eps
             - jnp.float32(_HALF_LOG_2PI)
             - jnp.log(std * (1.0 - t * t + 1e-7)))

    out_ref[...] = jnp.concatenate([2.0 * t, rlogp], axis=0)  # single lane-dense store


def _round_up(n, m):
    return (n + m - 1) // m * m


def policy_net_forward(x_in, params, eps, tb=None):
    """PolicyNet forward. x_in: (B, 3) f32, eps: (B, 1) f32 -> (2*tanh(a), rlogp)."""
    B = x_in.shape[0]
    if tb is None:
        # Lane-dense batch tile; big enough to amortize the ~0.35 us per-step
        # pipeline overhead while keeping intermediates (128, tb) f32 modest.
        tb = min(512, _round_up(B, 128))
    tb = _round_up(tb, 128)
    b_pad = _round_up(B, tb)

    # Batch-on-lanes (transposed) layout, padded to a tile multiple. Padded
    # columns compute harmless finite values and are sliced off below.
    x_t = jnp.zeros((IN_FEATURES, b_pad), jnp.float32).at[:, :B].set(x_in.T)
    eps_t = jnp.zeros((1, b_pad), jnp.float32).at[:, :B].set(eps.T)

    # Kernel-layout weights (tiny, one-time layout plumbing in the wrapper).
    w1_t = params["w1"].T.reshape(HIDDEN, IN_FEATURES)                    # (128, 3)
    b1_t = params["b1"].reshape(HIDDEN, 1)                                # (128, 1)
    wh = jnp.concatenate([params["w_mu"].T, params["w_std"].T], axis=0)   # (2, 128)
    bh = jnp.concatenate([params["b_mu"].reshape(1, 1),
                          params["b_std"].reshape(1, 1)], axis=0)         # (2, 1)

    grid = (pl.cdiv(b_pad, tb),)

    def batch_tile(feat):
        return pl.BlockSpec((feat, tb), lambda i: (0, i))

    def const(shape):
        return pl.BlockSpec(shape, lambda i: (0, 0))

    out = pl.pallas_call(
        _policy_kernel,
        out_shape=jax.ShapeDtypeStruct((2, b_pad), jnp.float32),
        grid=grid,
        in_specs=[
            batch_tile(IN_FEATURES),          # x (transposed)
            batch_tile(1),                    # eps (transposed)
            const((HIDDEN, IN_FEATURES)),     # fc1 weight
            const((HIDDEN, 1)),               # fc1 bias
            const((2, HIDDEN)),               # fused head weight
            const((2, 1)),                    # fused head bias
        ],
        out_specs=batch_tile(2),
        compiler_params=pltpu.CompilerParams(
            dimension_semantics=("parallel",)),
    )(x_t, eps_t, w1_t, b1_t, wh, bh)

    action = out[0, :B].reshape(B, 1)
    real_log_prob = out[1, :B].reshape(B, 1)
    return action, real_log_prob


def init_params(key):
    """Deterministic parameter init mimicking nn.Linear default (uniform)."""
    ks = jax.random.split(key, 6)

    def linear(kw, kb, fan_in, fan_out):
        bound = 1.0 / math.sqrt(fan_in)
        w = jax.random.uniform(kw, (fan_in, fan_out), jnp.float32, -bound, bound)
        b = jax.random.uniform(kb, (fan_out,), jnp.float32, -bound, bound)
        return w, b

    w1, b1 = linear(ks[0], ks[1], IN_FEATURES, HIDDEN)
    w_mu, b_mu = linear(ks[2], ks[3], HIDDEN, 1)
    w_std, b_std = linear(ks[4], ks[5], HIDDEN, 1)
    return {"w1": w1, "b1": b1, "w_mu": w_mu, "b_mu": b_mu,
            "w_std": w_std, "b_std": b_std}


def reference_forward(x_in, params, eps):
    """Pure-JAX reference (mirrors the PyTorch forward) for a sanity check."""
    h = jnp.maximum(x_in @ params["w1"] + params["b1"][None, :], 0.0)
    mu = h @ params["w_mu"] + params["b_mu"]
    std = jnp.logaddexp(h @ params["w_std"] + params["b_std"], 0.0)
    action = mu + std * eps
    log_prob = (-((action - mu) ** 2) / (2.0 * std * std)
                - jnp.log(std) - 0.5 * math.log(2.0 * math.pi))
    t = jnp.tanh(action)
    return 2.0 * t, log_prob - jnp.log(1.0 - t * t + 1e-7)


if __name__ == "__main__":
    key = jax.random.PRNGKey(0)
    k_param, k_x, k_eps = jax.random.split(key, 3)

    # Non-multiple of the 128-lane tile -> exercises padding and a 3-step grid.
    B = 300
    params = init_params(k_param)
    x_in = jax.random.normal(k_x, (B, IN_FEATURES), jnp.float32)
    eps = jax.random.normal(k_eps, (B, 1), jnp.float32)  # Normal.rsample noise

    action, log_prob = policy_net_forward(x_in, params, eps, tb=128)
    action = jax.block_until_ready(action)
    log_prob = jax.block_until_ready(log_prob)

    ref_action, ref_log_prob = reference_forward(x_in, params, eps)
    assert jnp.allclose(action, ref_action, atol=1e-4, rtol=1e-4)
    assert jnp.allclose(log_prob, ref_log_prob, atol=1e-4, rtol=1e-4)

    print("KERNEL_OK")
</pallas_src>

<mosaic_0001>
module attributes {stable_mosaic.version = 11 : i64} {
  func.func @_policy_kernel(%arg0: i32, %arg1: memref<3x128xf32, #tpu.memory_space<vmem>>, %arg2: memref<1x128xf32, #tpu.memory_space<vmem>>, %arg3: memref<128x3xf32, #tpu.memory_space<vmem>>, %arg4: memref<128x1xf32, #tpu.memory_space<vmem>>, %arg5: memref<2x128xf32, #tpu.memory_space<vmem>>, %arg6: memref<2x1xf32, #tpu.memory_space<vmem>>, %arg7: memref<2x128xf32, #tpu.memory_space<vmem>>) attributes {dimension_semantics = [#tpu.dimension_semantics<parallel>], iteration_bounds = array<i64: 3>, scalar_prefetch = 0 : i64, scratch_operands = 0 : i64, tpu.core_type = #tpu.core_type<tc>, window_params = [{transform_indices = @transform_0, window_bounds = array<i64: 3, 128>}, {transform_indices = @transform_1, window_bounds = array<i64: 1, 128>}, {pipeline_mode = #tpu.pipeline_mode<synchronous>, transform_indices = @transform_2, window_bounds = array<i64: 128, 3>}, {pipeline_mode = #tpu.pipeline_mode<synchronous>, transform_indices = @transform_3, window_bounds = array<i64: 128, 1>}, {pipeline_mode = #tpu.pipeline_mode<synchronous>, transform_indices = @transform_4, window_bounds = array<i64: 2, 128>}, {pipeline_mode = #tpu.pipeline_mode<synchronous>, transform_indices = @transform_5, window_bounds = array<i64: 2, 1>}, {transform_indices = @transform_6, window_bounds = array<i64: 2, 128>}]} {
    %c0 = arith.constant 0 : index
    %c0_0 = arith.constant 0 : index
    %0 = vector.load %arg1[%c0, %c0_0] : memref<3x128xf32, #tpu.memory_space<vmem>>, vector<3x128xf32>
    %c0_1 = arith.constant 0 : index
    %c0_2 = arith.constant 0 : index
    %1 = vector.load %arg3[%c0_1, %c0_2] : memref<128x3xf32, #tpu.memory_space<vmem>>, vector<128x3xf32>
    %2 = vector.extract_strided_slice %1 {offsets = [0, 0], sizes = [128, 1], strides = [1, 1]} : vector<128x3xf32> to vector<128x1xf32>
    %3 = vector.extract_strided_slice %0 {offsets = [0, 0], sizes = [1, 128], strides = [1, 1]} : vector<3x128xf32> to vector<1x128xf32>
    %4 = vector.broadcast %2 : vector<128x1xf32> to vector<128x128xf32>
    %5 = vector.broadcast %3 : vector<1x128xf32> to vector<128x128xf32>
    %6 = arith.mulf %4, %5 : vector<128x128xf32>
    %7 = vector.extract_strided_slice %1 {offsets = [0, 1], sizes = [128, 1], strides = [1, 1]} : vector<128x3xf32> to vector<128x1xf32>
    %8 = vector.extract_strided_slice %0 {offsets = [1, 0], sizes = [1, 128], strides = [1, 1]} : vector<3x128xf32> to vector<1x128xf32>
    %9 = vector.broadcast %7 : vector<128x1xf32> to vector<128x128xf32>
    %10 = vector.broadcast %8 : vector<1x128xf32> to vector<128x128xf32>
    %11 = arith.mulf %9, %10 : vector<128x128xf32>
    %12 = arith.addf %6, %11 : vector<128x128xf32>
    %13 = vector.extract_strided_slice %1 {offsets = [0, 2], sizes = [128, 1], strides = [1, 1]} : vector<128x3xf32> to vector<128x1xf32>
    %14 = vector.extract_strided_slice %0 {offsets = [2, 0], sizes = [1, 128], strides = [1, 1]} : vector<3x128xf32> to vector<1x128xf32>
    %15 = vector.broadcast %13 : vector<128x1xf32> to vector<128x128xf32>
    %16 = vector.broadcast %14 : vector<1x128xf32> to vector<128x128xf32>
    %17 = arith.mulf %15, %16 : vector<128x128xf32>
    %18 = arith.addf %12, %17 : vector<128x128xf32>
    %c0_3 = arith.constant 0 : index
    %c0_4 = arith.constant 0 : index
    %19 = vector.load %arg4[%c0_3, %c0_4] : memref<128x1xf32, #tpu.memory_space<vmem>>, vector<128x1xf32>
    %20 = vector.broadcast %19 : vector<128x1xf32> to vector<128x128xf32>
    %21 = arith.addf %18, %20 : vector<128x128xf32>
    %cst = arith.constant 0.000000e+00 : f32
    %22 = vector.broadcast %cst : f32 to vector<128x128xf32>
    %23 = arith.maximumf %21, %22 : vector<128x128xf32>
    %c0_5 = arith.constant 0 : index
    %c0_6 = arith.constant 0 : index
    %24 = vector.load %arg5[%c0_5, %c0_6] : memref<2x128xf32, #tpu.memory_space<vmem>>, vector<2x128xf32>
    %cst_7 = arith.constant dense<0.000000e+00> : vector<2x128xf32>
    %25 = tpu.matmul %24, %23, %cst_7 {dimension_numbers = #tpu.dot_dimension_numbers<[1], [0], [0], [1], [0, 0, 1, 1], [], []>} : vector<2x128xf32>, vector<128x128xf32>, vector<2x128xf32> -> vector<2x128xf32>
    %c0_8 = arith.constant 0 : index
    %c0_9 = arith.constant 0 : index
    %26 = vector.load %arg6[%c0_8, %c0_9] : memref<2x1xf32, #tpu.memory_space<vmem>>, vector<2x1xf32>
    %27 = vector.broadcast %26 : vector<2x1xf32> to vector<2x128xf32>
    %28 = arith.addf %25, %27 : vector<2x128xf32>
    %29 = vector.extract_strided_slice %28 {offsets = [0, 0], sizes = [1, 128], strides = [1, 1]} : vector<2x128xf32> to vector<1x128xf32>
    %30 = vector.extract_strided_slice %28 {offsets = [1, 0], sizes = [1, 128], strides = [1, 1]} : vector<2x128xf32> to vector<1x128xf32>
    %cst_10 = arith.constant 0.000000e+00 : f32
    %31 = vector.broadcast %cst_10 : f32 to vector<1x128xf32>
    %32 = arith.maximumf %30, %31 : vector<1x128xf32>
    %33 = vector.broadcast %cst_10 : f32 to vector<1x128xf32>
    %34 = arith.subf %30, %33 : vector<1x128xf32>
    %35 = arith.cmpf one, %34, %34 : vector<1x128xf32>
    %36 = vector.broadcast %cst_10 : f32 to vector<1x128xf32>
    %37 = arith.addf %30, %36 : vector<1x128xf32>
    %38 = math.absf %34 : vector<1x128xf32>
    %cst_11 = arith.constant 0.000000e+00 : f32
    %39 = vector.broadcast %cst_11 : f32 to vector<1x128xf32>
    %40 = arith.subf %39, %38 : vector<1x128xf32>
    %41 = math.exp %40 : vector<1x128xf32>
    %42 = math.log1p %41 : vector<1x128xf32>
    %43 = arith.addf %32, %42 : vector<1x128xf32>
    %44 = arith.select %35, %37, %43 : vector<1x128xi1>, vector<1x128xf32>
    %c0_12 = arith.constant 0 : index
    %c0_13 = arith.constant 0 : index
    %45 = vector.load %arg2[%c0_12, %c0_13] : memref<1x128xf32, #tpu.memory_space<vmem>>, vector<1x128xf32>
    %46 = arith.mulf %44, %45 : vector<1x128xf32>
    %47 = arith.addf %29, %46 : vector<1x128xf32>
    %48 = math.tanh %47 : vector<1x128xf32>
    %cst_14 = arith.constant -5.000000e-01 : f32
    %49 = vector.broadcast %cst_14 : f32 to vector<1x128xf32>
    %50 = arith.mulf %49, %45 : vector<1x128xf32>
    %51 = arith.mulf %50, %45 : vector<1x128xf32>
    %cst_15 = arith.constant 0.918938517 : f32
    %52 = vector.broadcast %cst_15 : f32 to vector<1x128xf32>
    %53 = arith.subf %51, %52 : vector<1x128xf32>
    %54 = arith.mulf %48, %48 : vector<1x128xf32>
    %cst_16 = arith.constant 1.000000e+00 : f32
    %55 = vector.broadcast %cst_16 : f32 to vector<1x128xf32>
    %56 = arith.subf %55, %54 : vector<1x128xf32>
    %cst_17 = arith.constant 1.000000e-07 : f32
    %57 = vector.broadcast %cst_17 : f32 to vector<1x128xf32>
    %58 = arith.addf %56, %57 : vector<1x128xf32>
    %59 = arith.mulf %44, %58 : vector<1x128xf32>
    %60 = math.log %59 : vector<1x128xf32>
    %61 = arith.subf %53, %60 : vector<1x128xf32>
    %cst_18 = arith.constant 2.000000e+00 : f32
    %62 = vector.broadcast %cst_18 : f32 to vector<1x128xf32>
    %63 = arith.mulf %62, %48 : vector<1x128xf32>
    %64 = tpu.concatenate %63, %61 in 0 : vector<1x128xf32>, vector<1x128xf32> -> vector<2x128xf32>
    %c0_19 = arith.constant 0 : index
    %c0_20 = arith.constant 0 : index
    %65 = vector.load %arg7[%c0_19, %c0_20] : memref<2x128xf32, #tpu.memory_space<vmem>>, vector<2x128xf32>
    tpu.vector_store %arg7[%c0_19, %c0_20], %64 {strides = array<i32>} : memref<2x128xf32, #tpu.memory_space<vmem>>, vector<2x128xf32>,
    return
  }
  func.func @transform_0(%arg0: i32) -> (i32, i32) {
    %c0_i32 = arith.constant 0 : i32
    %c0_i32_0 = arith.constant 0 : i32
    return %c0_i32, %arg0 : i32, i32
  }
  func.func @transform_1(%arg0: i32) -> (i32, i32) {
    %c0_i32 = arith.constant 0 : i32
    %c0_i32_0 = arith.constant 0 : i32
    return %c0_i32, %arg0 : i32, i32
  }
  func.func @transform_2(%arg0: i32) -> (i32, i32) {
    %c0_i32 = arith.constant 0 : i32
    %c0_i32_0 = arith.constant 0 : i32
    %c0_i32_1 = arith.constant 0 : i32
    return %c0_i32, %c0_i32_0 : i32, i32
  }
  func.func @transform_3(%arg0: i32) -> (i32, i32) {
    %c0_i32 = arith.constant 0 : i32
    %c0_i32_0 = arith.constant 0 : i32
    %c0_i32_1 = arith.constant 0 : i32
    return %c0_i32, %c0_i32_0 : i32, i32
  }
  func.func @transform_4(%arg0: i32) -> (i32, i32) {
    %c0_i32 = arith.constant 0 : i32
    %c0_i32_0 = arith.constant 0 : i32
    %c0_i32_1 = arith.constant 0 : i32
    return %c0_i32, %c0_i32_0 : i32, i32
  }
  func.func @transform_5(%arg0: i32) -> (i32, i32) {
    %c0_i32 = arith.constant 0 : i32
    %c0_i32_0 = arith.constant 0 : i32
    %c0_i32_1 = arith.constant 0 : i32
    return %c0_i32, %c0_i32_0 : i32, i32
  }
  func.func @transform_6(%arg0: i32) -> (i32, i32) {
    %c0_i32 = arith.constant 0 : i32
    %c0_i32_0 = arith.constant 0 : i32
    return %c0_i32, %arg0 : i32, i32
  }
}

</mosaic_0001>

<bundles_post_ra>
// kernel: tpu_custom_call.1
= control target key start
LH: loop header
LB: loop body
LE: loop exit
PB: predicated region body
PF: predicated region fallthrough
CT: control target
= control target key end

     0   :  { %11 = vsyncpa [#allocation3], 0  ;;  %s1564_s0 = inlined_call_operand.vmem [shape: f32[3,384], index: 0, kind: input, shape index: {}]   ;;  %s1565_s1 = inlined_call_operand.vmem [shape: f32[1,384], index: 1, kind: input, shape index: {}]   ;;  %s1566_s2 = inlined_call_operand.vmem [shape: f32[128,3], index: 2, kind: input, shape index: {}]   ;;  %s1567_s3 = inlined_call_operand.vmem [shape: f32[128,1], index: 3, kind: input, shape index: {}]   ;;  %s1568_s4 = inlined_call_operand.vmem [shape: f32[2,128], index: 4, kind: input, shape index: {}]   ;;  %s1569_s5 = inlined_call_operand.vmem [shape: f32[2,1], index: 5, kind: input, shape index: {}]   ;;  %s1570_s6 = inlined_call_operand.hbm [shape: f32[2,384], index: 6, kind: output, shape index: {}]  }
   0x1   :  { %13 = vsyncpa [#allocation3 + $0x1], 0  ;;  %s1211_s21 = smov 0   ;;  %s1213_s22 = smov 0  }
   0x2   :  { %s1215_s23 = smov 0   ;;  %s1217_s24 = smov 0  }
   0x3 LB: > { %s1232_s25 = sadd.s32 4294967295, %s1166_s24   ;;  %s936_s26 = sadd.s32 4294967294, %s1166_s24   ;;  %s1166_s24 = sphi %s1217_s24, %s1576_s24   ;;  %s1162_s23 = sphi %s1215_s23, %s1575_s23   ;;  %s1158_s22 = sphi %s1213_s22, %s1574_s22   ;;  %s1154_s21 = sphi %s1211_s21, %s1573_s21  }
   0x4   : > { %s1236_s27 = sadd.s32 1, %s1166_s24   ;;  %s162_s28 = sadd.s32 1, %s1162_s23 }
   0x5   : > { %s159_s29 = ssub.s32 %s1166_s24, %s1236_s27  ;;  %p172_p0 = scmp.ne.s32.totalorder %s1162_s23, %s1158_s22 }
   0x6   : > { %p160_p1 = scmp.eq.s32.totalorder %s159_s29, 0  ;;  %p173_p2 = scmp.eq.s32.totalorder %s1232_s25, 2 }
   0x7   : > { %p178_p3 = scmp.ne.s32.totalorder %s1158_s22, %s1154_s21  ;;  %p179_p4 = scmp.eq.s32.totalorder %s936_s26, 2 }
   0x8   : > { %s1247_s30 = scalar_select %p160_p1, %s1162_s23, %s162_s28  }
   0x9   : > { %p1249_p5 = por %p173_p2, %p172_p0  ;;  %p1253_p6 = por %p179_p4, %p178_p3 }
   0xa   : > { %p939_p7 = scmp.ge.s32.totalorder %s1166_s24, 1  ;;  %p222_p8 = scmp.lt.s32.totalorder %s1166_s24, 4 }
   0xc   : > { %p223_p9 = pnand %p939_p7, %p222_p8 }
   0xd   : > { %v262_v0 = vld [vmem:[%s1566_s2] sm:$0xff] (!%p223_p9)  ;;  %v1168_v1 = vmov (!%p223_p9), 2   ;;  %v1169_v2 = vmov (!%p223_p9), 1   ;;  %v264_v3 = vld [vmem:[%s1566_s2 + $0x10] sm:$0xff] (!%p223_p9)  ;;  %v263_v4 = vld [vmem:[%s1566_s2 + $0x8] sm:$0xff] (!%p223_p9)  ;;  %v1170_v7 = vmov (!%p223_p9), 0   ;;  %v358_v44 = vlaneseq (!%p223_p9) }
   0xe   : > { %226 = sbr.rel (%p223_p9) target bundleno = 646 (0x286), region = 44  ;;  %1070 = vset.pattern.permute.xlu0 (!%p223_p9), %v1168_v1  ;;  %1069 = vset.pattern.permute.xlu1 (!%p223_p9), %v1169_v2  ;;  %v267_v5 = vld [vmem:[%s1566_s2 + $0x28] sm:$0xff] (!%p223_p9)  ;;  %v266_v6 = vld [vmem:[%s1566_s2 + $0x20] sm:$0xff] (!%p223_p9)  ;;  %v269_v8 = vld [vmem:[%s1566_s2 + $0x38] sm:$0xff] (!%p223_p9)  ;;  %v1171_v19 = vmov (!%p223_p9), 0.0|0.0   ;;  %p254_p10 = scmp.lt.s32.totalorder (!%p223_p9), %s1232_s25, 2 }
   0xf   : > { %479 = vperm.xlu0 (!%p223_p9), %1070, %v262_v0   ;;  %379 = vperm.xlu1 (!%p223_p9), %1069, %v262_v0   ;;  %v1286_v9 = vld [vmem:[%s1566_s2 + $0x48] sm:$0xff] (!%p223_p9)  ;;  %v265_v10 = vld [vmem:[%s1566_s2 + $0x18] sm:$0xff] (!%p223_p9)  ;;  %v578_v14 = vld [vmem:[%s1567_s3] sm:$0xff] (!%p223_p9)  ;;  %v1410_v48 = vshrl.u32 (!%p223_p9), %v358_v44, 7  ;;  %vm1172_vm0 = vmmov (!%p223_p9), 0   ;;  %s944_s12 = sshll.u32 (!%p223_p9), %s1232_s25, 5 }
  0x10   : > { %v1295_v11 = vld [vmem:[%s1566_s2 + $0x58] sm:$0xff] (!%p223_p9)  ;;  %v1301_v12 = vld [vmem:[%s1566_s2 + $0x68] sm:$0xff] (!%p223_p9)  ;;  %v268_v16 = vld [vmem:[%s1566_s2 + $0x30] sm:$0xff] (!%p223_p9)  ;;  %999 = vmatprep.subr.bf16.mxu0 (!%p223_p9), %v1171_v19  ;;  %vm851_vm3 = vcmask (!%p223_p9), 1040384   ;;  %s1522_s17 = scalar_lea.hbm (!%p223_p9), %s1570_s6, %s944_s12  ;;  %s1175_s19 = smov (!%p223_p9), [#allocation2]  }
  0x11   : > { %v1308_v13 = vld [vmem:[%s1566_s2 + $0x78] sm:$0xff] (!%p223_p9)  ;;  %v579_v15 = vld [vmem:[%s1567_s3 + $0x8] sm:$0xff] (!%p223_p9)  ;;  %v580_v17 = vld [vmem:[%s1567_s3 + $0x10] sm:$0xff] (!%p223_p9)  ;;  %v444_v51 = vsub.s32 (!%p223_p9), 1, %v1410_v48  ;;  %v1419_v53 = vsub.s32 (!%p223_p9), 0, %v1410_v48  ;;  %v544_v57 = vsub.s32 (!%p223_p9), 2, %v1410_v48 }
  0x12   : > { %v582_v18 = vld [vmem:[%s1567_s3 + $0x20] sm:$0xff] (!%p223_p9)  ;;  %v581_v20 = vld [vmem:[%s1567_s3 + $0x18] sm:$0xff] (!%p223_p9)  ;;  %v584_v21 = vld [vmem:[%s1567_s3 + $0x30] sm:$0xff] (!%p223_p9)  ;;  %s1108_s26 = sshll.u32 (!%p223_p9), %s1175_s19, 4  ;;  %s1109_s26 = int_to_ptr.vmem [resolvable:$false] %s1108_s26 }
  0x13   : > { %487 = vperm.xlu0 (!%p223_p9), %1070, %v264_v3   ;;  %383 = vperm.xlu1 (!%p223_p9), %1069, %v263_v4   ;;  %v586_v22 = vld [vmem:[%s1567_s3 + $0x40] sm:$0xff] (!%p223_p9)  ;;  %v588_v23 = vld [vmem:[%s1567_s3 + $0x50] sm:$0xff] (!%p223_p9)  ;;  %v583_v24 = vld [vmem:[%s1567_s3 + $0x28] sm:$0xff] (!%p223_p9)  ;;  %s1110_s28 = scalar_lea.vmem (!%p223_p9), %s1109_s26, 64 }
  0x14   : > { %v270_v25 = vld [vmem:[%s1566_s2 + $0x40] sm:$0xff] (!%p223_p9)  ;;  %v593_v27 = vld [vmem:[%s1567_s3 + $0x78] sm:$0xff] (!%p223_p9)  ;;  %v272_v29 = vld [vmem:[%s1566_s2 + $0x50] sm:$0xff] (!%p223_p9) }
  0x15   : > { %v590_v26 = vld [vmem:[%s1567_s3 + $0x60] sm:$0xff]  ;;  %v585_v28 = vld [vmem:[%s1567_s3 + $0x38] sm:$0xff]  ;;  %v587_v30 = vld [vmem:[%s1567_s3 + $0x48] sm:$0xff]  ;;  %s1398_s20 = scalar_select %p254_p10, %s1232_s25, 2 }
  0x16   : > { %v274_v33 = vld [vmem:[%s1566_s2 + $0x60] sm:$0xff]  ;;  %v589_v43 = vld [vmem:[%s1567_s3 + $0x58] sm:$0xff]  ;;  %v276_v47 = vld [vmem:[%s1566_s2 + $0x70] sm:$0xff] }
  0x17   : > { %499 = vperm.xlu0 %1070, %v267_v5   ;;  %1071 = vset.pattern.permute.xlu1 %v1168_v1  ;;  %s941_s29 = sshll.u32 %s1398_s20, 2  ;;  %s260_s10 = scalar_lea.vmem %s1565_s1, %s1398_s20 }
  0x18   : > { %483 = vperm.xlu1 %1071, %v263_v4   ;;  %s257_s13 = scalar_lea.vmem %s1564_s0, %s941_s29  ;;  %s251_s20 = sand.u32 1, %s1158_s22  }
  0x19   : > { %v261_v52 = vld [vmem:[%s257_s13] sm:$0x7]  ;;  %s940_s11 = sshll.u32 %s251_s20, 1  ;;  %s855_s18 = scalar_lea.sflag [#allocation3], %s251_s20 }
  0x1a   : > { %v1424_v56 = vrot.slane %v261_v52, %v444_v51  ;;  %v1428_v58 = vrot.slane %v261_v52, %v1419_v53  ;;  %v1432_v62 = vrot.slane %v261_v52, %v544_v57  ;;  %s253_s13 = scalar_lea.vmem [#allocation2], %s940_s11 }
  0x1b   : > { %1078 = vset.pattern.permute.xlu0 %v1169_v2  ;;  %s868_s14 = sshll.u32 %s253_s13, 4  ;;  %s1524_s14 = int_to_ptr.vmem [resolvable:$true] %s868_s14 }
  0x1c   : > { %395 = vperm.xlu0 %1078, %v266_v6   ;;  %1072 = vset.pattern.permute.xlu1 %v1170_v7  ;;  %s1104_s25 = scalar_lea.vmem %s1524_s14, 32  ;;  %p1111_p0 = scmp.lt.s32.totalorder %s1524_s14, %s1109_s26 }
  0x1d   : > { %290 = vperm.xlu1 %1072, %v264_v3   ;;  %p1105_p11 = scmp.ne.s32.totalorder %s1524_s14, %s1104_s25  ;;  %p1112_p1 = scmp.lt.s32.totalorder %s1110_s28, %s1104_s25 }
  0x1f   : > { %p1106_p12 = pnand %p1105_p11, %p1249_p5  ;;  %p1113_p2 = por %p1112_p1, %p1111_p0 }
  0x20   : > { %407 = vperm.xlu0 %1078, %v269_v8  }
  0x21   : > { %1073 = vset.pattern.permute.xlu1 %v1169_v2  ;;  %p1107_p13 = pneg %p1106_p12 }
  0x22   : > { %387 = vperm.xlu1 %1073, %v264_v3  }
  0x23   : > { %p1114_p3 = pnand %p1113_p2, %p1107_p13 }
  0x24   : > { %415 = vperm.xlu0 %1078, %v1286_v9  }
  0x26   : > { %391 = vperm.xlu1 %1073, %v265_v10  }
  0x28   : > { %423 = vperm.xlu0 %1078, %v1295_v11  }
  0x2a   : > { %1074 = vset.pattern.permute.xlu1 %v1168_v1 }
  0x2b   : > { %491 = vperm.xlu1 %1074, %v265_v10  }
  0x2c   : > { %431 = vperm.xlu0 %1078, %v1301_v12  }
  0x2f   : > { %1075 = vset.pattern.permute.xlu1 %v1170_v7 }
  0x30   : > { %439 = vperm.xlu0 %1078, %v1308_v13   ;;  %596 = vperm.xlu1 %1075, %v578_v14  }
  0x34   : > { %1093 = vset.pattern.permute.xlu0 %v1170_v7  ;;  %300 = vperm.xlu1 %1075, %v266_v6  }
  0x35   : > { %280 = vperm.xlu0 %1093, %v262_v0  }
  0x38   : > { %305 = vperm.xlu1 %1075, %v267_v5  }
  0x39   : > { %285 = vperm.xlu0 %1093, %v263_v4  }
  0x3c   : > { %1076 = vset.pattern.permute.xlu1 %v1169_v2 }
  0x3d   : > { %295 = vperm.xlu0 %1093, %v265_v10   ;;  %399 = vperm.xlu1 %1076, %v267_v5  }
  0x41   : > { %601 = vperm.xlu0 %1093, %v579_v15   ;;  %1077 = vset.pattern.permute.xlu1 %v1168_v1 }
  0x42   : > { %495 = vperm.xlu1 %1077, %v266_v6  }
  0x45   : > { %310 = vperm.xlu0 %1093, %v268_v16  }
  0x46   : > { %1079 = vset.pattern.permute.xlu1 %v1170_v7 }
  0x47   : > { %606 = vperm.xlu1 %1079, %v580_v17  }
  0x49   : > { %616 = vperm.xlu0 %1093, %v582_v18  }
  0x4b   : > { %611 = vperm.xlu1 %1079, %v581_v20  }
  0x4d   : > { %325 = vperm.xlu0 %1093, %v1286_v9  }
  0x4f   : > { %315 = vperm.xlu1 %1079, %v269_v8  }
  0x51   : > { %626 = vperm.xlu0 %1093, %v584_v21  }
  0x53   : > { %1080 = vset.pattern.permute.xlu1 %v1169_v2 }
  0x54   : > { %403 = vperm.xlu1 %1080, %v268_v16  }
  0x55   : > { %335 = vperm.xlu0 %1093, %v1295_v11  }
  0x58   : > { %1081 = vset.pattern.permute.xlu1 %v1168_v1 }
  0x59   : > { %503 = vperm.xlu1 %1081, %v268_v16   ;;  %636 = vperm.xlu0 %1093, %v586_v22  }
  0x5d   : > { %507 = vperm.xlu1 %1081, %v269_v8   ;;  %345 = vperm.xlu0 %1093, %v1301_v12  }
  0x61   : > { %1082 = vset.pattern.permute.xlu1 %v1170_v7  ;;  %646 = vperm.xlu0 %1093, %v588_v23  }
  0x62   : > { %621 = vperm.xlu1 %1082, %v583_v24  }
  0x65   : > { %355 = vperm.xlu0 %1093, %v1308_v13  }
  0x66   : > { %320 = vperm.xlu1 %1082, %v270_v25  }
  0x69   : > { %656 = vperm.xlu0 %1093, %v590_v26   ;;  %v707_v26 = vld [vmem:[%s1569_s5] sm:$0x3] }
  0x6a   : > { %1083 = vset.pattern.permute.xlu1 %v1169_v2 }
  0x6b   : > { %411 = vperm.xlu1 %1083, %v270_v25  }
  0x6d   : > { %671 = vperm.xlu0 %1093, %v593_v27  }
  0x6f   : > { %1084 = vset.pattern.permute.xlu1 %v1168_v1 }
  0x70   : > { %511 = vperm.xlu1 %1084, %v270_v25  }
  0x74   : > { %515 = vperm.xlu1 %1084, %v1286_v9   ;;  %v591_v9 = vld [vmem:[%s1567_s3 + $0x68] sm:$0xff] }
  0x78   : > { %1085 = vset.pattern.permute.xlu1 %v1170_v7 }
  0x79   : > { %631 = vperm.xlu1 %1085, %v585_v28  }
  0x7d   : > { %330 = vperm.xlu1 %1085, %v272_v29  }
  0x81   : > { %1086 = vset.pattern.permute.xlu1 %v1169_v2 }
  0x82   : > { %419 = vperm.xlu1 %1086, %v272_v29  }
  0x86   : > { %1087 = vset.pattern.permute.xlu1 %v1168_v1 }
  0x87   : > { %519 = vperm.xlu1 %1087, %v272_v29  }
  0x8b   : > { %523 = vperm.xlu1 %1087, %v1295_v11  }
  0x8e   : > { %v380_v31 = vpop.permute.xlu1 %379  ;;  %v480_v32 = vpop.permute.xlu0 %479 }
  0x8f   : > { %1088 = vset.pattern.permute.xlu1 %v1170_v7  ;;  %v446_v61 = vmul.f32 %v1424_v56, %v380_v31  ;;  %v546_v0 = vmul.f32 %v1432_v62, %v480_v32 }
  0x90   : > { %641 = vperm.xlu1 %1088, %v587_v30  }
  0x92   : > { %v384_v34 = vpop.permute.xlu1 %383  ;;  %v1383_v35 = vpop.permute.xlu0 %487 }
  0x93   : > { %v447_v5 = vmul.f32 %v1424_v56, %v384_v34  ;;  %v548_v23 = vmul.f32 %v1432_v62, %v1383_v35  ;;  %v1173_v35 = vmov 0.0  }
  0x94   : > { %340 = vperm.xlu1 %1088, %v274_v33   ;;  %996 = vmatprep.mubr.msk.f32.mxu0 %vm1172_vm0, %v1173_v35 }
  0x96   : > { %v1385_v36 = vpop.permute.xlu0 %499 }
  0x97   : > { %v484_v37 = vpop.permute.xlu1 %483 }
  0x98   : > { %1089 = vset.pattern.permute.xlu1 %v1169_v2 }
  0x99   : > { %427 = vperm.xlu1 %1089, %v274_v33  }
  0x9b   : > { %v1388_v38 = vpop.permute.xlu0 %395 }
  0x9c   : > { %v291_v39 = vpop.permute.xlu1 %290  ;;  %v450_v51 = vmul.f32 %v1424_v56, %v1388_v38 }
  0x9d   : > { %1090 = vset.pattern.permute.xlu1 %v1168_v1  ;;  %v364_v18 = vmul.f32 %v1428_v58, %v291_v39 }
  0x9e   : > { %527 = vperm.xlu1 %1090, %v274_v33  }
  0x9f   : > { %v1391_v40 = vpop.permute.xlu0 %407 }
  0xa1   : > { %v388_v41 = vpop.permute.xlu1 %387 }
  0xa2   : > { %531 = vperm.xlu1 %1090, %v1301_v12   ;;  %v547_v12 = vmul.f32 %v1432_v62, %v484_v37  ;;  %v448_v14 = vmul.f32 %v1424_v56, %v388_v41 }
  0xa3   : > { %v1395_v42 = vpop.permute.xlu0 %415 }
  0xa5   : > { %v392_v45 = vpop.permute.xlu1 %391 }
  0xa6   : > { %1091 = vset.pattern.permute.xlu1 %v1170_v7  ;;  %v449_v24 = vmul.f32 %v1424_v56, %v392_v45 }
  0xa7   : > { %651 = vperm.xlu1 %1091, %v589_v43   ;;  %v1404_v46 = vpop.permute.xlu0 %423 }
  0xaa   : > { %v492_v49 = vpop.permute.xlu1 %491 }
  0xab   : > { %350 = vperm.xlu1 %1091, %v276_v47   ;;  %v1415_v50 = vpop.permute.xlu0 %431  ;;  %v549_v31 = vmul.f32 %v1432_v62, %v492_v49 }
  0xaf   : > { %1092 = vset.pattern.permute.xlu1 %v1169_v2  ;;  %v597_v54 = vpop.permute.xlu1 %596  ;;  %v1422_v55 = vpop.permute.xlu0 %439 }
  0xb0   : > { %435 = vperm.xlu1 %1092, %v276_v47  }
  0xb3   : > { %v301_v59 = vpop.permute.xlu1 %300 }
  0xb4   : > { %v281_v60 = vpop.permute.xlu0 %280  ;;  %1094 = vset.pattern.permute.xlu1 %v1168_v1  ;;  %v366_v52 = vmul.f32 %v1428_v58, %v301_v59 }
  0xb5   : > { %v362_v63 = vmul.f32 %v1428_v58, %v281_v60  ;;  %535 = vperm.xlu1 %1094, %v276_v47  }
  0xb7   : > { %v462_v2 = vadd.f32 %v446_v61, %v362_v63  ;;  %v306_v3 = vpop.permute.xlu1 %305  ;;  %v551_v63 = vmul.f32 %v1432_v62, %v1385_v36 }
  0xb8   : > { %v286_v4 = vpop.permute.xlu0 %285  ;;  %v367_v60 = vmul.f32 %v1428_v58, %v306_v3 }
  0xb9   : > { %v363_v6 = vmul.f32 %v1428_v58, %v286_v4  ;;  %539 = vperm.xlu1 %1094, %v1308_v13   ;;  %v562_v8 = vadd.f32 %v546_v0, %v462_v2  ;;  %v592_v13 = vld [vmem:[%s1567_s3 + $0x70] sm:$0xff]  ;;  %v466_v0 = vadd.f32 %v450_v51, %v366_v52 }
  0xbb   : > { %v463_v1 = vadd.f32 %v447_v5, %v363_v6  ;;  %v674_v16 = vadd.f32 %v597_v54, %v562_v8 }
  0xbc   : > { %v296_v10 = vpop.permute.xlu0 %295  ;;  %v400_v11 = vpop.permute.xlu1 %399 }
  0xbd   : > { %1095 = vset.pattern.permute.xlu1 %v1170_v7  ;;  %v563_v15 = vadd.f32 %v547_v12, %v463_v1  ;;  %v365_v20 = vmul.f32 %v1428_v58, %v296_v10  ;;  %v464_v7 = vadd.f32 %v448_v14, %v364_v18  ;;  %v690_v27 = vmax.f32 %v674_v16, 0.0 }
  0xbe   : > { %661 = vperm.xlu1 %1095, %v591_v9   ;;  %v451_v54 = vmul.f32 %v1424_v56, %v400_v11 }
  0xbf   : > { %v465_v28 = vadd.f32 %v449_v24, %v365_v20  ;;  %v564_v32 = vadd.f32 %v548_v23, %v464_v7 }
  0xc0   : > { %v602_v17 = vpop.permute.xlu0 %601  ;;  %v467_v2 = vadd.f32 %v451_v54, %v367_v60 }
  0xc1   : > { %v675_v21 = vadd.f32 %v602_v17, %v563_v15  ;;  %v496_v22 = vpop.permute.xlu1 %495  ;;  %v565_v34 = vadd.f32 %v549_v31, %v465_v28  ;;  %v453_v17 = vmul.f32 %v1424_v56, %v1391_v40 }
  0xc2   : > { %666 = vperm.xlu1 %1095, %v592_v13   ;;  %v550_v61 = vmul.f32 %v1432_v62, %v496_v22  ;;  %v567_v1 = vadd.f32 %v551_v63, %v467_v2 }
  0xc3   : > { %v691_v25 = vmax.f32 %v675_v21, 0.0 }
  0xc4   : > { %v311_v49 = vpop.permute.xlu0 %310  ;;  %v566_v6 = vadd.f32 %v550_v61, %v466_v0 }
  0xc5   : > { %v1000_v29 = vpack.c.bf16 %v691_v25, %v690_v27  ;;  %v368_v14 = vmul.f32 %v1428_v58, %v311_v49 }
  0xc6   : > { %710 = vperm.xlu1 %1095, %v707_v26   ;;  %v607_v30 = vpop.permute.xlu1 %606 }
  0xc7   : > { %1001 = vmatpush3.bf16.msra.mxu0 %v1000_v29  ;;  %v676_v33 = vadd.f32 %v607_v30, %v564_v32 }
  0xc8   : > { %1002 = vmatprep.subr.bf16.mxu0 %v1171_v19  ;;  %v617_v5 = vpop.permute.xlu0 %616 }
  0xc9   : > { %v692_v41 = vmax.f32 %v676_v33, 0.0  ;;  %v678_v8 = vadd.f32 %v617_v5, %v566_v6 }
  0xca   : > { %v612_v37 = vpop.permute.xlu1 %611 }
  0xcb   : > { %v677_v39 = vadd.f32 %v612_v37, %v565_v34  ;;  %v694_v59 = vmax.f32 %v678_v8, 0.0  ;;  %v455_v34 = vmul.f32 %v1424_v56, %v1395_v42 }
  0xcc   : > { %v326_v15 = vpop.permute.xlu0 %325 }
  0xcd   : > { %v693_v43 = vmax.f32 %v677_v39, 0.0  ;;  %v371_v35 = vmul.f32 %v1428_v58, %v326_v15 }
  0xce   : > { %v316_v44 = vpop.permute.xlu1 %315 }
  0xcf   : > { %v1003_v45 = vpack.c.bf16 %v693_v43, %v692_v41  ;;  %v369_v18 = vmul.f32 %v1428_v58, %v316_v44 }
  0xd0   : > { %v627_v7 = vpop.permute.xlu0 %626 }
  0xd1   : > { %1004 = vmatpush3.bf16.msra.mxu0 %v1003_v45  ;;  %v469_v24 = vadd.f32 %v453_v17, %v369_v18  ;;  %v471_v45 = vadd.f32 %v455_v34, %v371_v35 }
  0xd2   : > { %1005 = vmatprep.subr.bf16.mxu0 %v1171_v19 }
  0xd3   : > { %v404_v47 = vpop.permute.xlu1 %403 }
  0xd4   : > { %v452_v36 = vmul.f32 %v1424_v56, %v404_v47  ;;  %v336_v43 = vpop.permute.xlu0 %335 }
  0xd6   : > { %v468_v20 = vadd.f32 %v452_v36, %v368_v14 }
  0xd8   : > { %v504_v57 = vpop.permute.xlu1 %503  ;;  %v637_v52 = vpop.permute.xlu0 %636 }
  0xd9   : > { %v552_v13 = vmul.f32 %v1432_v62, %v504_v57 }
  0xdb   : > { %v568_v21 = vadd.f32 %v552_v13, %v468_v20 }
  0xdc   : > { %v508_v4 = vpop.permute.xlu1 %507 }
  0xdd   : > { %v553_v22 = vmul.f32 %v1432_v62, %v508_v4  ;;  %v680_v25 = vadd.f32 %v627_v7, %v568_v21 }
  0xdf   : > { %v569_v26 = vadd.f32 %v553_v22, %v469_v24  ;;  %v696_v29 = vmax.f32 %v680_v25, 0.0 }
  0xe1   : > { %v622_v38 = vpop.permute.xlu1 %621 }
  0xe2   : > { %v679_v9 = vadd.f32 %v622_v38, %v567_v1  ;;  %v346_v38 = vpop.permute.xlu0 %345 }
  0xe4   : > { %v695_v10 = vmax.f32 %v679_v9, 0.0  ;;  %v457_v9 = vmul.f32 %v1424_v56, %v1404_v46 }
  0xe5   : > { %v321_v11 = vpop.permute.xlu1 %320 }
  0xe6   : > { %v1006_v12 = vpack.c.bf16 %v695_v10, %v694_v59  ;;  %v370_v37 = vmul.f32 %v1428_v58, %v321_v11  ;;  %v373_v59 = vmul.f32 %v1428_v58, %v336_v43  ;;  %v647_v36 = vpop.permute.xlu0 %646 }
  0xe8   : > { %1007 = vmatpush3.bf16.msra.mxu0 %v1006_v12  ;;  %v473_v14 = vadd.f32 %v457_v9, %v373_v59 }
  0xe9   : > { %1008 = vmatprep.subr.bf16.mxu0 %v1171_v19 }
  0xea   : > { %v412_v3 = vpop.permute.xlu1 %411  ;;  %v356_v7 = vpop.permute.xlu0 %355 }
  0xeb   : > { %v454_v33 = vmul.f32 %v1424_v56, %v412_v3 }
  0xed   : > { %v470_v44 = vadd.f32 %v454_v33, %v370_v37 }
  0xee   : > { %v657_v34 = vpop.permute.xlu0 %656 }
  0xef   : > { %v512_v16 = vpop.permute.xlu1 %511 }
  0xf0   : > { %v554_v39 = vmul.f32 %v1432_v62, %v512_v16 }
  0xf2   : > { %v570_v47 = vadd.f32 %v554_v39, %v470_v44 }
  0xf3   : > { %v516_v23 = vpop.permute.xlu1 %515 }
  0xf4   : > { %v555_v49 = vmul.f32 %v1432_v62, %v516_v23  ;;  %v682_v54 = vadd.f32 %v637_v52, %v570_v47  ;;  %v672_v52 = vpop.permute.xlu0 %671 }
  0xf6   : > { %v571_v57 = vadd.f32 %v555_v49, %v471_v45  ;;  %v698_v42 = vmax.f32 %v682_v54, 0.0 }
  0xf8   : > { %v632_v27 = vpop.permute.xlu1 %631 }
  0xf9   : > { %v681_v28 = vadd.f32 %v632_v27, %v569_v26 }
  0xfb   : > { %v697_v30 = vmax.f32 %v681_v28, 0.0  ;;  %v459_v28 = vmul.f32 %v1424_v56, %v1415_v50 }
  0xfc   : > { %v331_v31 = vpop.permute.xlu1 %330 }
  0xfd   : > { %v1009_v32 = vpack.c.bf16 %v697_v30, %v696_v29  ;;  %v372_v6 = vmul.f32 %v1428_v58, %v331_v31  ;;  %v461_v29 = vmul.f32 %v1424_v56, %v1422_v55  ;;  %v375_v30 = vmul.f32 %v1428_v58, %v346_v38 }
  0xfe   : > { %v377_v31 = vmul.f32 %v1428_v58, %v356_v7 }
  0xff   : > { %1010 = vmatpush3.bf16.msra.mxu0 %v1009_v32  ;;  %v475_v37 = vadd.f32 %v459_v28, %v375_v30  ;;  %v1174_v28 = vmov 1966171168  }
 0x100   : > { %1011 = vmatprep.subr.bf16.mxu0 %v1171_v19  ;;  %v477_v39 = vadd.f32 %v461_v29, %v377_v31  ;;  %v828_v29 = vunpack.c.l.s4 %v1174_v28 }
 0x101   : > { %v420_v40 = vpop.permute.xlu1 %419 }
 0x102   : > { %v456_v5 = vmul.f32 %v1424_v56, %v420_v40  ;;  %v829_v30 = vunpack.c.0.s8 %v828_v29 }
 0x104   : > { %v472_v10 = vadd.f32 %v456_v5, %v372_v6 }
 0x106   : > { %v520_v41 = vpop.permute.xlu1 %519 }
 0x107   : > { %v556_v8 = vmul.f32 %v1432_v62, %v520_v41 }
 0x109   : > { %v572_v11 = vadd.f32 %v556_v8, %v472_v10 }
 0x10a   : > { %v524_v51 = vpop.permute.xlu1 %523 }
 0x10b   : > { %v557_v12 = vmul.f32 %v1432_v62, %v524_v51  ;;  %v684_v15 = vadd.f32 %v647_v36, %v572_v11 }
 0x10d   : > { %v573_v13 = vadd.f32 %v557_v12, %v473_v14  ;;  %v700_v18 = vmax.f32 %v684_v15, 0.0  ;;  %v801_v14 = vld [vmem:[%s260_s10] sm:$0x1] }
 0x10e   : > { %v814_v31 = vmul.f32 -0.5, %v801_v14 }
 0x10f   : > { %v642_v60 = vpop.permute.xlu1 %641 }
 0x110   : > { %v683_v61 = vadd.f32 %v642_v60, %v571_v57 }
 0x112   : > { %v699_v63 = vmax.f32 %v683_v61, 0.0 }
 0x113   : > { %v341_v0 = vpop.permute.xlu1 %340 }
 0x114   : > { %v1012_v2 = vpack.c.bf16 %v699_v63, %v698_v42  ;;  %v374_v24 = vmul.f32 %v1428_v58, %v341_v0 }
 0x116   : > { %1013 = vmatpush3.bf16.msra.mxu0 %v1012_v2 }
 0x117   : > { %1014 = vmatprep.subr.bf16.mxu0 %v1171_v19 }
 0x118   : > { %v428_v4 = vpop.permute.xlu1 %427 }
 0x119   : > { %v458_v23 = vmul.f32 %v1424_v56, %v428_v4 }
 0x11b   : > { %v474_v27 = vadd.f32 %v458_v23, %v374_v24 }
 0x11d   : > { %v528_v1 = vpop.permute.xlu1 %527 }
 0x11e   : > { %v558_v25 = vmul.f32 %v1432_v62, %v528_v1 }
 0x120   : > { %v574_v32 = vadd.f32 %v558_v25, %v474_v27 }
 0x121   : > { %v532_v3 = vpop.permute.xlu1 %531 }
 0x122   : > { %v559_v40 = vmul.f32 %v1432_v62, %v532_v3  ;;  %v686_v43 = vadd.f32 %v657_v34, %v574_v32  ;;  %v832_v32 = vsub.s32 %v829_v30, %v1410_v48  ;;  %v815_v34 = vmul.f32 %v814_v31, %v801_v14 }
 0x124   : > { %v575_v45 = vadd.f32 %v559_v40, %v475_v37  ;;  %v702_v57 = vmax.f32 %v686_v43, 0.0  ;;  %v942_v37 = vadd.f32 -0.9189385, %v815_v34 }
 0x126   : > { %v652_v16 = vpop.permute.xlu1 %651 }
 0x127   : > { %v685_v17 = vadd.f32 %v652_v16, %v573_v13 }
 0x129   : > { %v701_v20 = vmax.f32 %v685_v17, 0.0  ;;  %v806_v17 = vrot.slane %v801_v14, %v1419_v53 }
 0x12a   : > { %v351_v21 = vpop.permute.xlu1 %350 }
 0x12b   : > { %v1015_v22 = vpack.c.bf16 %v701_v20, %v700_v18  ;;  %v376_v50 = vmul.f32 %v1428_v58, %v351_v21 }
 0x12d   : > { %1016 = vmatpush3.bf16.msra.mxu0 %v1015_v22 }
 0x12e   : > { %1017 = vmatprep.subr.bf16.mxu0 %v1171_v19 }
 0x12f   : > { %v436_v46 = vpop.permute.xlu1 %435 }
 0x130   : > { %v460_v41 = vmul.f32 %v1424_v56, %v436_v46 }
 0x132   : > { %v476_v49 = vadd.f32 %v460_v41, %v376_v50 }
 0x134   : > { %v536_v26 = vpop.permute.xlu1 %535 }
 0x135   : > { %v560_v55 = vmul.f32 %v1432_v62, %v536_v26 }
 0x137   : > { %v576_v61 = vadd.f32 %v560_v55, %v476_v49 }
 0x138   : > { %v540_v33 = vpop.permute.xlu1 %539 }
 0x139   : > { %v561_v35 = vmul.f32 %v1432_v62, %v540_v33  ;;  %v706_v62 = vld [vmem:[%s1568_s4] sm:$0x3] }
 0x13b   : > { %v577_v44 = vadd.f32 %v561_v35, %v477_v39 }
 0x13d   : > { %v662_v47 = vpop.permute.xlu1 %661  ;;  %v689_v54 = vadd.f32 %v672_v52, %v577_v44 }
 0x13e   : > { %v687_v51 = vadd.f32 %v662_v47, %v575_v45 }
 0x13f   : > { %v705_v56 = vmax.f32 %v689_v54, 0.0 }
 0x140   : > { %v703_v60 = vmax.f32 %v687_v51, 0.0 }
 0x141   : > { %v667_v42 = vpop.permute.xlu1 %666 }
 0x142   : > { %v1018_v63 = vpack.c.bf16 %v703_v60, %v702_v57  ;;  %v688_v0 = vadd.f32 %v667_v42, %v576_v61 }
 0x144   : > { %v704_v2 = vmax.f32 %v688_v0, 0.0  ;;  %1019 = vmatpush3.bf16.msra.mxu0 %v1018_v63 }
 0x145   : > { %1020 = vmatprep.subr.bf16.mxu0 %v1171_v19  ;;  %v711_v4 = vpop.permute.xlu1 %710 }
 0x146   : > { %v1021_v58 = vpack.c.bf16 %v705_v56, %v704_v2 }
 0x148   : > { %1022 = vmatpush3.bf16.msra.mxu0 %v1021_v58 }
 0x14b   : > { %997 = vmatmul.mubr.f32.vlgmr.msra.gmra.mrb[0].mxu0 %v706_v62 }
 0x21e   : > { %v779_v5 = vpop.f32.mrb[0].mxu0 }
 0x21f   : > { %v780_v6 = vadd.f32 %v779_v5, %v711_v4  ;;  %v998_v8 = vpop.f32.mrb[1].mxu0 }
 0x221   : > { %v786_v1 = vand.u32 2147483647, %v780_v6  ;;  %v783_v13 = vmax.f32 %v780_v6, 0.0  ;;  %vm784_vm2 = vcmp.ne.f32.partialorder %v780_v6, %v780_v6 }
 0x223   : > { %v787_v38 = vsub.f32 0.0, %v786_v1 }
 0x225   : > { %v788_v9 = vmul.f32 1.442695, %v787_v38 }
 0x227   : > { %1096 = vpow2.f32 %v788_v9 }
 0x231   : > { %v1097_v59 = vpop.eup %1096 }
 0x232   : > { %v790_v10 = vadd.f32 1.0, %v1097_v59  ;;  %v793_v19 = vmul.f32 -0.5, %v1097_v59  ;;  %v796_v12 = vand.u32 2147483647, %v1097_v59 }
 0x234   : > { %1098 = vlog2.f32 %v790_v10  ;;  %v794_v11 = vadd.f32 1.0, %v793_v19  ;;  %vm797_vm1 = vcmp.lt.f32.partialorder %v796_v12, 0.0004427343 }
 0x236   : > { %v795_v15 = vmul.f32 %v1097_v59, %v794_v11 }
 0x23e   : > { %v1099_v3 = vpop.eup %1098 }
 0x23f   : > { %v792_v36 = vmul.f32 0.6931472, %v1099_v3 }
 0x241   : > { %v798_v16 = vsel %vm797_vm1, %v795_v15, %v792_v36 }
 0x242   : > { %v799_v18 = vadd.f32 %v798_v16, %v783_v13 }
 0x244   : > { %v800_v20 = vsel %vm784_vm2, %v780_v6, %v799_v18 }
 0x245   : > { %v808_v21 = vmul.f32 %v806_v17, %v800_v20 }
 0x247   : > { %v810_v22 = vrot.slane %v808_v21, 1 }
 0x249   : > { %v812_v46 = vadd.f32 %v810_v22, %v780_v6 }
 0x24b   : > { %1100 = vtanh.f32 %v812_v46 }
 0x255   : > { %v1101_v23 = vpop.eup %1100 }
 0x256   : > { %v817_v7 = vmul.f32 %v1101_v23, %v1101_v23  ;;  %v844_v50 = vmul.f32 2.0, %v1101_v23 }
 0x258   : > { %v818_v24 = vsub.f32 1.0, %v817_v7 }
 0x25a   : > { %v819_v25 = vadd.f32 1e-07, %v818_v24 }
 0x25c   : > { %v821_v26 = vrot.slane %v819_v25, 7 }
 0x25e   : > { %v823_v27 = vmul.f32 %v821_v26, %v800_v20 }
 0x260   : > { %1102 = vlog2.f32 %v823_v27 }
 0x26a   : > { %v1103_v40 = vpop.eup %1102 }
 0x26b   : > { %v825_v33 = vmul.f32 0.6931472, %v1103_v40 }
 0x26d   : > { %v833_v35 = vrot.slane %v825_v33, %v832_v32 }
 0x26f   : > { %v834_v39 = vcombine.high %v833_v35, %v833_v35 }
 0x271   : > { %v841_v41 = vrot.slane %v834_v39, %v832_v32 }
 0x273   : > { %v843_v43 = vsub.f32 %v942_v37, %v841_v41 }
 0x275   : > { %v849_v55 = vrot.slane %v843_v43, %v1419_v53 }
 0x277   : > { %v852_v48 = vsel %vm851_vm3, %v844_v50, %v849_v55 }
 0x278   : > { %853 = vst [vmem:[%s253_s13] sm:$0x3] %v852_v48 }
 0x279   : > { %1117 = shalt.err (!%p1114_p3)
}
 0x27a   : > { %s1118_s29 = scalar_lea.hbm %s1522_s17, 32  ;;  %s1122_s20 = scalar_lea.hbm %s1570_s6, 96 }
 0x27b   : > { %p1119_p4 = scmp.ne.s32.totalorder %s1522_s17, %s1118_s29  ;;  %p1123_p9 = scmp.lt.u32.totalorder %s1522_s17, %s1570_s6 }
 0x27c   : > { %p1124_p10 = scmp.lt.u32.totalorder %s1122_s20, %s1118_s29  ;;  %p1126_p12 = scmp.lt.u32.totalorder %s1118_s29, %s1522_s17 }
 0x27d   : > { %p1120_p7 = pnand %p1119_p4, %p1249_p5 }
 0x27e   : > { %p1125_p11 = por %p1124_p10, %p1123_p9 }
 0x27f   : > { %p1121_p8 = pneg %p1120_p7 }
 0x280   : > { %p1127_p13 = por %p1126_p12, %p1125_p11 }
 0x282   : > { %p1128_p0 = pnand %p1127_p13, %p1121_p8 }
 0x284   : > { %1131 = shalt.err (!%p1128_p0)
}
 0x285   : > { %1023 = dma.vmem_to_hbm [thread:$0]  (%p1249_p5), %s1524_s14, 32, %s1522_s17, %s855_s18  }
 0x286 PF: > { %p1029_p1 = scmp.ge.s32.totalorder %s1166_s24, 2  ;;  %s880_s13 = sand.u32 1, %s1154_s21  }
 0x287   : > { %s881_s15 = scalar_lea.sflag [#allocation3], %s880_s13 }
 0x288   : > { %p1026_p2 = pnand %p1029_p1, %p1253_p6 }
 0x28a   : > { %1149 = dma.done.wait (!%p1026_p2), %s881_s15, 32  }
 0x28b   : > { %1151 = vsyncadd (!%p1026_p2), %s881_s15, 4294967264  ;;  %p16_p3 = scmp.ge.s32.totalorder %s1236_s27, 5   ;;  %s1573_s21 = smov %s1158_s22 }
 0x28c   : > { %s1574_s22 = smov %s1162_s23  ;;  %s1575_s23 = smov %s1247_s30 }
 0x28d   : > { %s1576_s24 = smov %s1236_s27  ;;  %18 = sbr.rel (!%p16_p3) target bundleno = 3 (0x3), region = 82 }
 0x294   :  { %886 = vsyncpa [#allocation3], 1 }
 0x295   :  { %888 = vsyncpa [#allocation3 + $0x1], 1 }

</bundles_post_ra>
